<compile_context>
chip_gen: v7x
topology: tpu7x:2x2x1
jax: 0.10.0
libtpu: 0.0.40
codegen_flags: <defaults>
</compile_context>

<pallas_src>
import functools

import jax
import jax.numpy as jnp
from jax.experimental import pallas as pl
from jax.experimental.pallas import tpu as pltpu


def _infonce_kernel(a_ref, p_ref, n_ref, o_ref, ia_ref, pos_ref, m_ref, s_ref, *,
                    temperature, batch_size, num_neg):
    """One (batch block i, negatives block kn) grid step.

    a_ref:   (TB, 1, D)   anchor, rank-3 so the a.neg contraction uses the batched
                          MXU matmul pattern ('bqd,bkd->bqk').
    p_ref:   (TB, D)      positive (only read on the first negatives block).
    n_ref:   (TB, TN, D)  negatives block, kept in the input dtype.
    o_ref:   (1, 8, 128)  per-batch-block partial loss sum (written on the last kn).
    scratch: ia (1/||a||), pos (positive logit), m/s (online logsumexp state),
             all (TB, 1) f32, persistent across the kn reduction axis.
    """
    i = pl.program_id(0)
    kn = pl.program_id(1)
    tb, tn, d = n_ref.shape

    eps_sq = jnp.float32(1e-24)            # F.normalize eps = 1e-12, squared
    inv_t = jnp.float32(1.0 / temperature)

    neg = n_ref[...]                        # (TB, TN, D), input dtype (never upcast)
    a3 = a_ref[...]                         # (TB, 1, D),  input dtype

    @pl.when(kn == 0)
    def _init():
        # Per-row stats reused across all negatives blocks of this batch block.
        a2 = a3.reshape(tb, d).astype(jnp.float32)
        p2 = p_ref[...].astype(jnp.float32)
        a_sq = jnp.sum(a2 * a2, axis=1, keepdims=True)
        p_sq = jnp.sum(p2 * p2, axis=1, keepdims=True)
        inv_a = jax.lax.rsqrt(jnp.maximum(a_sq, eps_sq))
        inv_p = jax.lax.rsqrt(jnp.maximum(p_sq, eps_sq))
        pos = jnp.sum(a2 * p2, axis=1, keepdims=True) * (inv_a * inv_p) * inv_t
        ia_ref[...] = inv_a
        pos_ref[...] = pos
        m_ref[...] = pos                          # running max starts at the positive logit
        s_ref[...] = jnp.ones_like(s_ref)         # exp(pos - m) == 1

    # a . neg on the MXU (batched over rows), f32 accumulate, inputs in native dtype.
    raw = jnp.einsum("bqd,bkd->bqk", a3, neg,
                     preferred_element_type=jnp.float32).reshape(tb, tn)      # (TB, TN)
    # ||neg||^2: one elementwise square pass + MXU ones-contraction
    # (no f32 tile copy, no XLU lane reduce over the (TB, TN, D) tile).
    ones3 = jnp.ones((tb, 1, d), dtype=neg.dtype)
    n_sq = jnp.einsum("bkd,bqd->bkq", neg * neg, ones3,
                      preferred_element_type=jnp.float32).reshape(tb, tn)     # (TB, TN)
    inv_n = jax.lax.rsqrt(jnp.maximum(n_sq, eps_sq))

    # Fold both reciprocal norms and 1/T into per-logit scales.
    neg_logits = raw * (ia_ref[...] * inv_n) * inv_t                          # (TB, TN)

    # Mask columns of a partial last negatives block before the online update.
    col = kn * tn + jax.lax.broadcasted_iota(jnp.int32, (tb, tn), 1)
    neg_logits = jnp.where(col < num_neg, neg_logits, -jnp.inf)

    # Online logsumexp across negatives blocks (reduction axis is the last grid axis).
    m_prev = m_ref[...]
    m_new = jnp.maximum(m_prev, jnp.max(neg_logits, axis=1, keepdims=True))
    s_ref[...] = (s_ref[...] * jnp.exp(m_prev - m_new)
                  + jnp.sum(jnp.exp(neg_logits - m_new), axis=1, keepdims=True))
    m_ref[...] = m_new

    @pl.when(kn == pl.num_programs(1) - 1)
    def _finalize():
        # loss_i = logsumexp([pos_i, neg_i,:]) - pos_i
        loss = m_ref[...] + jnp.log(s_ref[...]) - pos_ref[...]                # (TB, 1)
        # Mask rows of a partial last batch block (mask stays on the final per-row loss).
        row = i * tb + jax.lax.broadcasted_iota(jnp.int32, (tb, 1), 0)
        loss = jnp.where(row < batch_size, loss, 0.0)
        part = jnp.sum(loss, axis=0, keepdims=True)                           # (1, 1)
        o_ref[...] = jnp.broadcast_to(part.reshape(1, 1, 1), o_ref.shape)


def _sublane_multiple(dtype):
    # Dtype-native sublane packing: 8 for f32, 16 for bf16, 32 for int8/fp8.
    return max(8, 32 // jnp.dtype(dtype).itemsize)


def _tpu_generation():
    try:
        kind = jax.devices()[0].device_kind.lower()
    except Exception:
        return None
    for tag in ("v7", "v6", "v5"):
        if tag in kind:
            return tag
    return None


def _choose_tiles(batch, num_neg, dim, dtype, target_bytes):
    """Pick (block_b, block_n) so the negatives tile is ~target_bytes, preferring to
    cover the full negatives axis (single kn step) when it fits."""
    itemsize = jnp.dtype(dtype).itemsize
    sub = _sublane_multiple(dtype)
    rows = target_bytes // max(1, num_neg * dim * itemsize)
    if rows >= batch:
        return batch, num_neg
    if rows >= sub:
        return max(sub, int(rows) // sub * sub), num_neg
    # N*D is too large even for `sub` rows at the target: tile the negatives axis too.
    block_b = min(batch, sub)
    cols = target_bytes // max(1, block_b * dim * itemsize)
    if cols >= num_neg:
        return block_b, num_neg
    return block_b, min(num_neg, max(sub, int(cols) // sub * sub))


def infonce_loss(anchor, positive, negatives, temperature=0.05,
                 block_b=None, block_n=None):
    """anchor: (B, D), positive: (B, D), negatives: (B, N, D) (f32 or bf16, same dtype).
    Returns the scalar InfoNCE loss (cross-entropy with the positive at index 0)."""
    batch, dim = anchor.shape
    _, num_neg, _ = negatives.shape
    dtype = negatives.dtype
    itemsize = jnp.dtype(dtype).itemsize

    # Generation-aware tile target & scoped-VMEM limit:
    #   v5e/v6e: 128 MiB physical VMEM -> ~8 MiB negatives tiles, limit up to 96 MiB.
    #   v7x / unknown: 64 MiB physical VMEM -> ~4 MiB tiles, limit capped at 48 MiB.
    gen = _tpu_generation()
    if gen in ("v5", "v6"):
        target_bytes, vmem_cap = 8 << 20, 96 << 20
    else:
        target_bytes, vmem_cap = 4 << 20, 48 << 20

    auto_b, auto_n = _choose_tiles(batch, num_neg, dim, dtype, target_bytes)
    block_b = int(min(block_b if block_b is not None else auto_b, batch))
    block_n = int(min(block_n if block_n is not None else auto_n, num_neg))
    nb = pl.cdiv(batch, block_b)
    nn = pl.cdiv(num_neg, block_n)

    # Per-step working set: 2x double-buffered negatives tile + 1x in-kernel square
    # temporary + small anchor/positive/output/scratch buffers.
    neg_tile = block_b * block_n * dim * itemsize
    vmem_limit = int(min(vmem_cap, max(32 << 20, 4 * neg_tile + (8 << 20))))

    kernel = functools.partial(_infonce_kernel, temperature=float(temperature),
                               batch_size=batch, num_neg=num_neg)

    partials = pl.pallas_call(
        kernel,
        out_shape=jax.ShapeDtypeStruct((nb, 8, 128), jnp.float32),
        grid_spec=pltpu.PrefetchScalarGridSpec(
            num_scalar_prefetch=0,
            grid=(nb, nn),                          # negatives (reduction) axis last
            in_specs=[
                pl.BlockSpec((block_b, 1, dim), lambda i, j: (i, 0, 0)),
                pl.BlockSpec((block_b, dim), lambda i, j: (i, 0)),
                pl.BlockSpec((block_b, block_n, dim), lambda i, j: (i, j, 0)),
            ],
            out_specs=pl.BlockSpec((1, 8, 128), lambda i, j: (i, 0, 0)),
            scratch_shapes=[
                pltpu.VMEM((block_b, 1), jnp.float32),   # 1/||a||
                pltpu.VMEM((block_b, 1), jnp.float32),   # positive logit
                pltpu.VMEM((block_b, 1), jnp.float32),   # running max
                pltpu.VMEM((block_b, 1), jnp.float32),   # running sum
            ],
        ),
        compiler_params=pltpu.CompilerParams(
            # Batch blocks are independent (per-block outputs) -> "parallel" lets v7x
            # megacore shard them; the negatives axis carries the online-logsumexp
            # scratch, so it stays "arbitrary".
            dimension_semantics=("parallel", "arbitrary"),
            vmem_limit_bytes=vmem_limit,
        ),
    )(anchor[:, None, :], positive, negatives)

    # Final mean over the per-batch-block partial sums (plain JAX, trivial size).
    return jnp.sum(partials[:, 0, 0]) / batch


def _infonce_ref(anchor, positive, negatives, temperature=0.05):
    """Pure-JAX reference mirroring the PyTorch module."""
    eps = 1e-12
    a = anchor / jnp.maximum(jnp.linalg.norm(anchor, axis=1, keepdims=True), eps)
    p = positive / jnp.maximum(jnp.linalg.norm(positive, axis=1, keepdims=True), eps)
    n = negatives / jnp.maximum(jnp.linalg.norm(negatives, axis=2, keepdims=True), eps)
    pos = jnp.sum(a * p, axis=1, keepdims=True) / temperature
    negl = jnp.einsum("bd,bnd->bn", a, n) / temperature
    logits = jnp.concatenate([pos, negl], axis=1)
    labels = jnp.zeros((anchor.shape[0],), dtype=jnp.int32)
    logp = jax.nn.log_softmax(logits, axis=1)
    return -jnp.mean(jnp.take_along_axis(logp, labels[:, None], axis=1))


if __name__ == "__main__":
    B, N, D = 20, 12, 128   # exercises partial blocks on both the batch and negatives axes
    key = jax.random.PRNGKey(0)
    k_a, k_p, k_n = jax.random.split(key, 3)
    anchor = jax.random.normal(k_a, (B, D), dtype=jnp.float32)
    positive = jax.random.normal(k_p, (B, D), dtype=jnp.float32)
    negatives = jax.random.normal(k_n, (B, N, D), dtype=jnp.float32)

    ref = _infonce_ref(anchor, positive, negatives)

    # 1) Forced small tiles: grid (3, 2) -> multi-block batch + negatives axes, partial
    #    last block on both, online logsumexp across kn steps, masked rows/columns.
    loss_tiled = jax.jit(functools.partial(infonce_loss, block_b=8, block_n=8))(
        anchor, positive, negatives)
    jax.block_until_ready(loss_tiled)
    # Tolerance covers default (bf16-pass) MXU precision for f32 dots on TPU.
    assert jnp.allclose(loss_tiled, ref, atol=5e-3, rtol=5e-3), (loss_tiled, ref)

    # 2) Auto tile selection (single-block fast path at these shapes).
    loss_auto = jax.jit(infonce_loss)(anchor, positive, negatives)
    jax.block_until_ready(loss_auto)
    assert jnp.allclose(loss_auto, ref, atol=5e-3, rtol=5e-3), (loss_auto, ref)

    # 3) bf16 inputs: the streamed negatives tensor moves half the HBM bytes and feeds
    #    the MXU directly (no in-kernel f32 copy).
    a16 = anchor.astype(jnp.bfloat16)
    p16 = positive.astype(jnp.bfloat16)
    n16 = negatives.astype(jnp.bfloat16)
    ref16 = _infonce_ref(a16.astype(jnp.float32), p16.astype(jnp.float32),
                         n16.astype(jnp.float32))
    loss_bf16 = jax.jit(infonce_loss)(a16, p16, n16)
    jax.block_until_ready(loss_bf16)
    assert jnp.allclose(loss_bf16, ref16, atol=2e-2, rtol=2e-2), (loss_bf16, ref16)

    print("KERNEL_OK")
</pallas_src>

<mosaic_0001>
module attributes {stable_mosaic.version = 11 : i64} {
  func.func @_infonce_kernel(%arg0: i32, %arg1: i32, %arg2: memref<8x1x128xf32, #tpu.memory_space<vmem>>, %arg3: memref<8x128xf32, #tpu.memory_space<vmem>>, %arg4: memref<8x8x128xf32, #tpu.memory_space<vmem>>, %arg5: memref<1x8x128xf32, #tpu.memory_space<vmem>>, %arg6: memref<8x1xf32, #tpu.memory_space<vmem>>, %arg7: memref<8x1xf32, #tpu.memory_space<vmem>>, %arg8: memref<8x1xf32, #tpu.memory_space<vmem>>, %arg9: memref<8x1xf32, #tpu.memory_space<vmem>>) attributes {dimension_semantics = [#tpu.dimension_semantics<parallel>, #tpu.dimension_semantics<arbitrary>], iteration_bounds = array<i64: 3, 2>, scalar_prefetch = 0 : i64, scratch_operands = 4 : i64, tpu.core_type = #tpu.core_type<tc>, window_params = [{transform_indices = @transform_0, window_bounds = array<i64: 8, 1, 128>}, {transform_indices = @transform_1, window_bounds = array<i64: 8, 128>}, {transform_indices = @transform_2, window_bounds = array<i64: 8, 8, 128>}, {transform_indices = @transform_3, window_bounds = array<i64: 1, 8, 128>}]} {
    %c0 = arith.constant 0 : index
    %c0_0 = arith.constant 0 : index
    %c0_1 = arith.constant 0 : index
    %0 = vector.load %arg4[%c0, %c0_0, %c0_1] : memref<8x8x128xf32, #tpu.memory_space<vmem>>, vector<8x8x128xf32>
    %c0_2 = arith.constant 0 : index
    %c0_3 = arith.constant 0 : index
    %c0_4 = arith.constant 0 : index
    %1 = vector.load %arg2[%c0_2, %c0_3, %c0_4] : memref<8x1x128xf32, #tpu.memory_space<vmem>>, vector<8x1x128xf32>
    %c0_i32 = arith.constant 0 : i32
    %2 = arith.cmpi eq, %arg1, %c0_i32 : i32
    %3 = arith.extui %2 : i1 to i32
    %cst = arith.constant 1.000000e-24 : f32
    %cst_5 = arith.constant 2.000000e+01 : f32
    %c0_i32_6 = arith.constant 0 : i32
    %4 = arith.cmpi ne, %3, %c0_i32_6 : i32
    scf.if %4 {
      %47 = vector.shape_cast %1 : vector<8x1x128xf32> to vector<8x128xf32>
      %c0_26 = arith.constant 0 : index
      %c0_27 = arith.constant 0 : index
      %48 = vector.load %arg3[%c0_26, %c0_27] : memref<8x128xf32, #tpu.memory_space<vmem>>, vector<8x128xf32>
      %49 = arith.mulf %47, %47 : vector<8x128xf32>
      %cst_28 = arith.constant dense<0.000000e+00> : vector<8xf32>
      %50 = vector.multi_reduction <add>, %49, %cst_28 [1] : vector<8x128xf32> to vector<8xf32>
      %51 = vector.shape_cast %50 : vector<8xf32> to vector<8x1xf32>
      %52 = arith.mulf %48, %48 : vector<8x128xf32>
      %cst_29 = arith.constant dense<0.000000e+00> : vector<8xf32>
      %53 = vector.multi_reduction <add>, %52, %cst_29 [1] : vector<8x128xf32> to vector<8xf32>
      %54 = vector.shape_cast %53 : vector<8xf32> to vector<8x1xf32>
      %55 = vector.broadcast %cst : f32 to vector<8x1xf32>
      %56 = arith.maximumf %51, %55 : vector<8x1xf32>
      %57 = math.rsqrt %56 : vector<8x1xf32>
      %58 = vector.broadcast %cst : f32 to vector<8x1xf32>
      %59 = arith.maximumf %54, %58 : vector<8x1xf32>
      %60 = math.rsqrt %59 : vector<8x1xf32>
      %61 = arith.mulf %47, %48 : vector<8x128xf32>
      %cst_30 = arith.constant dense<0.000000e+00> : vector<8xf32>
      %62 = vector.multi_reduction <add>, %61, %cst_30 [1] : vector<8x128xf32> to vector<8xf32>
      %63 = vector.shape_cast %62 : vector<8xf32> to vector<8x1xf32>
      %64 = arith.mulf %57, %60 : vector<8x1xf32>
      %65 = arith.mulf %63, %64 : vector<8x1xf32>
      %66 = vector.broadcast %cst_5 : f32 to vector<8x1xf32>
      %67 = arith.mulf %65, %66 : vector<8x1xf32>
      %c0_31 = arith.constant 0 : index
      %c0_32 = arith.constant 0 : index
      %68 = vector.load %arg6[%c0_31, %c0_32] : memref<8x1xf32, #tpu.memory_space<vmem>>, vector<8x1xf32>
      tpu.vector_store %arg6[%c0_31, %c0_32], %57 {strides = array<i32>} : memref<8x1xf32, #tpu.memory_space<vmem>>, vector<8x1xf32>,
      %c0_33 = arith.constant 0 : index
      %c0_34 = arith.constant 0 : index
      %69 = vector.load %arg7[%c0_33, %c0_34] : memref<8x1xf32, #tpu.memory_space<vmem>>, vector<8x1xf32>
      tpu.vector_store %arg7[%c0_33, %c0_34], %67 {strides = array<i32>} : memref<8x1xf32, #tpu.memory_space<vmem>>, vector<8x1xf32>,
      %c0_35 = arith.constant 0 : index
      %c0_36 = arith.constant 0 : index
      %70 = vector.load %arg8[%c0_35, %c0_36] : memref<8x1xf32, #tpu.memory_space<vmem>>, vector<8x1xf32>
      tpu.vector_store %arg8[%c0_35, %c0_36], %67 {strides = array<i32>} : memref<8x1xf32, #tpu.memory_space<vmem>>, vector<8x1xf32>,
      %cst_37 = arith.constant 1.000000e+00 : f32
      %71 = vector.broadcast %cst_37 : f32 to vector<8x1xf32>
      %c0_38 = arith.constant 0 : index
      %c0_39 = arith.constant 0 : index
      %72 = vector.load %arg9[%c0_38, %c0_39] : memref<8x1xf32, #tpu.memory_space<vmem>>, vector<8x1xf32>
      tpu.vector_store %arg9[%c0_38, %c0_39], %71 {strides = array<i32>} : memref<8x1xf32, #tpu.memory_space<vmem>>, vector<8x1xf32>,
    } else {
    }
    "tpu.trace_start"() <{level = 10 : i32, message = "bqd,bkd->bqk"}> : () -> ()
    %cst_7 = arith.constant dense<0.000000e+00> : vector<8x1x8xf32>
    %5 = tpu.matmul %1, %0, %cst_7 {dimension_numbers = #tpu.dot_dimension_numbers<[2], [2], [1], [1], [0, 0, 0, 1, 1, 1], [0], [0]>} : vector<8x1x128xf32>, vector<8x8x128xf32>, vector<8x1x8xf32> -> vector<8x1x8xf32>
    "tpu.trace_stop"() : () -> ()
    %6 = vector.shape_cast %5 : vector<8x1x8xf32> to vector<8x8xf32>
    %cst_8 = arith.constant 1.000000e+00 : f32
    %7 = vector.broadcast %cst_8 : f32 to vector<8x1x128xf32>
    %8 = arith.mulf %0, %0 : vector<8x8x128xf32>
    "tpu.trace_start"() <{level = 10 : i32, message = "bkd,bqd->bkq"}> : () -> ()
    %cst_9 = arith.constant dense<0.000000e+00> : vector<8x8x1xf32>
    %9 = tpu.matmul %8, %7, %cst_9 {dimension_numbers = #tpu.dot_dimension_numbers<[2], [2], [1], [1], [0, 0, 0, 1, 1, 1], [0], [0]>} : vector<8x8x128xf32>, vector<8x1x128xf32>, vector<8x8x1xf32> -> vector<8x8x1xf32>
    "tpu.trace_stop"() : () -> ()
    %10 = vector.shape_cast %9 : vector<8x8x1xf32> to vector<8x8xf32>
    %cst_10 = arith.constant 1.000000e-24 : f32
    %11 = vector.broadcast %cst_10 : f32 to vector<8x8xf32>
    %12 = arith.maximumf %10, %11 : vector<8x8xf32>
    %13 = math.rsqrt %12 : vector<8x8xf32>
    %c0_11 = arith.constant 0 : index
    %c0_12 = arith.constant 0 : index
    %14 = vector.load %arg6[%c0_11, %c0_12] : memref<8x1xf32, #tpu.memory_space<vmem>>, vector<8x1xf32>
    %15 = vector.broadcast %14 : vector<8x1xf32> to vector<8x8xf32>
    %16 = arith.mulf %15, %13 : vector<8x8xf32>
    %17 = arith.mulf %6, %16 : vector<8x8xf32>
    %cst_13 = arith.constant 2.000000e+01 : f32
    %18 = vector.broadcast %cst_13 : f32 to vector<8x8xf32>
    %19 = arith.mulf %17, %18 : vector<8x8xf32>
    %c8_i32 = arith.constant 8 : i32
    %20 = arith.muli %arg1, %c8_i32 : i32
    %21 = tpu.iota {dimensions = array<i32: 1>} : vector<8x8xi32>
    %22 = vector.broadcast %20 : i32 to vector<8x8xi32>
    %23 = arith.addi %22, %21 : vector<8x8xi32>
    %c12_i32 = arith.constant 12 : i32
    %24 = vector.broadcast %c12_i32 : i32 to vector<8x8xi32>
    %25 = arith.cmpi slt, %23, %24 : vector<8x8xi32>
    %cst_14 = arith.constant 0xFF800000 : f32
    %26 = vector.broadcast %cst_14 : f32 to vector<8x8xf32>
    %27 = arith.select %25, %19, %26 : vector<8x8xi1>, vector<8x8xf32>
    %c0_15 = arith.constant 0 : index
    %c0_16 = arith.constant 0 : index
    %28 = vector.load %arg8[%c0_15, %c0_16] : memref<8x1xf32, #tpu.memory_space<vmem>>, vector<8x1xf32>
    %cst_17 = arith.constant dense<0xFF800000> : vector<8xf32>
    %29 = vector.multi_reduction <maximumf>, %27, %cst_17 [1] : vector<8x8xf32> to vector<8xf32>
    %30 = vector.shape_cast %29 : vector<8xf32> to vector<8x1xf32>
    %31 = arith.maximumf %28, %30 : vector<8x1xf32>
    %c0_18 = arith.constant 0 : index
    %c0_19 = arith.constant 0 : index
    %32 = vector.load %arg9[%c0_18, %c0_19] : memref<8x1xf32, #tpu.memory_space<vmem>>, vector<8x1xf32>
    %33 = arith.subf %28, %31 : vector<8x1xf32>
    %34 = math.exp %33 : vector<8x1xf32>
    %35 = arith.mulf %32, %34 : vector<8x1xf32>
    %36 = vector.broadcast %31 : vector<8x1xf32> to vector<8x8xf32>
    %37 = arith.subf %27, %36 : vector<8x8xf32>
    %38 = math.exp %37 : vector<8x8xf32>
    %cst_20 = arith.constant dense<0.000000e+00> : vector<8xf32>
    %39 = vector.multi_reduction <add>, %38, %cst_20 [1] : vector<8x8xf32> to vector<8xf32>
    %40 = vector.shape_cast %39 : vector<8xf32> to vector<8x1xf32>
    %41 = arith.addf %35, %40 : vector<8x1xf32>
    %c0_21 = arith.constant 0 : index
    %c0_22 = arith.constant 0 : index
    %42 = vector.load %arg9[%c0_21, %c0_22] : memref<8x1xf32, #tpu.memory_space<vmem>>, vector<8x1xf32>
    tpu.vector_store %arg9[%c0_21, %c0_22], %41 {strides = array<i32>} : memref<8x1xf32, #tpu.memory_space<vmem>>, vector<8x1xf32>,
    %c0_23 = arith.constant 0 : index
    %c0_24 = arith.constant 0 : index
    %43 = vector.load %arg8[%c0_23, %c0_24] : memref<8x1xf32, #tpu.memory_space<vmem>>, vector<8x1xf32>
    tpu.vector_store %arg8[%c0_23, %c0_24], %31 {strides = array<i32>} : memref<8x1xf32, #tpu.memory_space<vmem>>, vector<8x1xf32>,
    %c1_i32 = arith.constant 1 : i32
    %44 = arith.cmpi eq, %arg1, %c1_i32 : i32
    %45 = arith.extui %44 : i1 to i32
    %c0_i32_25 = arith.constant 0 : i32
    %46 = arith.cmpi ne, %45, %c0_i32_25 : i32
    scf.if %46 {
      %c0_26 = arith.constant 0 : index
      %c0_27 = arith.constant 0 : index
      %47 = vector.load %arg8[%c0_26, %c0_27] : memref<8x1xf32, #tpu.memory_space<vmem>>, vector<8x1xf32>
      %c0_28 = arith.constant 0 : index
      %c0_29 = arith.constant 0 : index
      %48 = vector.load %arg9[%c0_28, %c0_29] : memref<8x1xf32, #tpu.memory_space<vmem>>, vector<8x1xf32>
      %49 = math.log %48 : vector<8x1xf32>
      %50 = arith.addf %47, %49 : vector<8x1xf32>
      %c0_30 = arith.constant 0 : index
      %c0_31 = arith.constant 0 : index
      %51 = vector.load %arg7[%c0_30, %c0_31] : memref<8x1xf32, #tpu.memory_space<vmem>>, vector<8x1xf32>
      %52 = arith.subf %50, %51 : vector<8x1xf32>
      %c8_i32_32 = arith.constant 8 : i32
      %53 = arith.muli %arg0, %c8_i32_32 : i32
      %54 = tpu.iota {dimensions = array<i32: 0>} : vector<8x1xi32>
      %55 = vector.broadcast %53 : i32 to vector<8x1xi32>
      %56 = arith.addi %55, %54 : vector<8x1xi32>
      %c20_i32 = arith.constant 20 : i32
      %57 = vector.broadcast %c20_i32 : i32 to vector<8x1xi32>
      %58 = arith.cmpi slt, %56, %57 : vector<8x1xi32>
      %cst_33 = arith.constant 0.000000e+00 : f32
      %59 = vector.broadcast %cst_33 : f32 to vector<8x1xf32>
      %60 = arith.select %58, %52, %59 : vector<8x1xi1>, vector<8x1xf32>
      %cst_34 = arith.constant dense<0.000000e+00> : vector<1xf32>
      %61 = vector.multi_reduction <add>, %60, %cst_34 [0] : vector<8x1xf32> to vector<1xf32>
      %62 = vector.shape_cast %61 : vector<1xf32> to vector<1x1xf32>
      %63 = vector.shape_cast %62 : vector<1x1xf32> to vector<1x1x1xf32>
      %64 = vector.shape_cast %63 : vector<1x1x1xf32> to vector<1x1x1xf32>
      %65 = vector.broadcast %64 : vector<1x1x1xf32> to vector<1x8x128xf32>
      %c0_35 = arith.constant 0 : index
      %c0_36 = arith.constant 0 : index
      %c0_37 = arith.constant 0 : index
      %66 = vector.load %arg5[%c0_35, %c0_36, %c0_37] : memref<1x8x128xf32, #tpu.memory_space<vmem>>, vector<1x8x128xf32>
      tpu.vector_store %arg5[%c0_35, %c0_36, %c0_37], %65 {strides = array<i32>} : memref<1x8x128xf32, #tpu.memory_space<vmem>>, vector<1x8x128xf32>,
    } else {
    }
    return
  }
  func.func @transform_0(%arg0: i32, %arg1: i32) -> (i32, i32, i32) {
    %c0_i32 = arith.constant 0 : i32
    %c0_i32_0 = arith.constant 0 : i32
    %c0_i32_1 = arith.constant 0 : i32
    return %arg0, %c0_i32, %c0_i32_0 : i32, i32, i32
  }
  func.func @transform_1(%arg0: i32, %arg1: i32) -> (i32, i32) {
    %c0_i32 = arith.constant 0 : i32
    %c0_i32_0 = arith.constant 0 : i32
    return %arg0, %c0_i32 : i32, i32
  }
  func.func @transform_2(%arg0: i32, %arg1: i32) -> (i32, i32, i32) {
    %c0_i32 = arith.constant 0 : i32
    %c0_i32_0 = arith.constant 0 : i32
    return %arg0, %arg1, %c0_i32 : i32, i32, i32
  }
  func.func @transform_3(%arg0: i32, %arg1: i32) -> (i32, i32, i32) {
    %c0_i32 = arith.constant 0 : i32
    %c0_i32_0 = arith.constant 0 : i32
    %c0_i32_1 = arith.constant 0 : i32
    return %arg0, %c0_i32, %c0_i32_0 : i32, i32, i32
  }
}

</mosaic_0001>

<bundles_post_ra>
// kernel: infonce_loss.1
= control target key start
LH: loop header
LB: loop body
LE: loop exit
PB: predicated region body
PF: predicated region fallthrough
CT: control target
= control target key end

     0   :  { %s1951_s12 = smov 0   ;;  %s1953_s13 = smov 0   ;;  %s2236_s0 = inlined_call_operand.vmem [shape: f32[20,1,128], index: 0, kind: input, shape index: {}]   ;;  %s2237_s1 = inlined_call_operand.vmem [shape: f32[20,128], index: 1, kind: input, shape index: {}]   ;;  %s2238_s2 = inlined_call_operand.vmem [shape: f32[20,12,128], index: 2, kind: input, shape index: {}]   ;;  %s2239_s3 = inlined_call_operand.vmem [shape: f32[3,8,128], index: 3, kind: output, shape index: {}]  }
   0x1   :  { %s1955_s14 = smov 0   ;;  %s1957_s15 = smov 0  }
   0x2   :  { %s1959_s16 = smov 0   ;;  %s1961_s17 = smov 0  }
   0x3   :  { %s1963_s18 = smov 0  }
   0x4 LB: > { %s22_s19 = sadd.s32 1, %s1883_s16  ;;  %s25_s20 = sadd.s32 1, %s1887_s17  ;;  %s1891_s18 = sphi %s1963_s18, %s13_s18   ;;  %s1887_s17 = sphi %s1961_s17, %s2248_s17   ;;  %s1883_s16 = sphi %s1959_s16, %s2247_s16   ;;  %s1879_s15 = sphi %s1957_s15, %s2246_s15   ;;  %s1875_s14 = sphi %s1955_s14, %s2245_s14   ;;  %s1871_s13 = sphi %s1953_s13, %s2244_s13   ;;  %s1867_s12 = sphi %s1951_s12, %s2243_s12  }
   0x5   : > { %p23_p0 = scmp.ge.s32.totalorder %s22_s19, 2  ;;  %p93_p1 = scmp.ne.s32.totalorder %s1871_s13, %s1867_s12 }
   0x6   : > { %p94_p2 = scmp.eq.s32.totalorder %s1891_s18, 0  ;;  %s86_s24 = sadd.s32 1, %s1871_s13 }
   0x7   : > { %s2250_s19 = smov (%p23_p0, %s22_s19), 0  ;;  %s2252_s20 = smov (!%p23_p0, %s25_s20), %s1887_s17 }
   0x8   : > { %p95_p3 = por %p94_p2, %p93_p1  ;;  %p27_p4 = scmp.ge.s32.totalorder %s2252_s20, 3 }
   0x9   : > { %s82_s21 = ssub.s32 %s1883_s16, %s2250_s19  ;;  %p1562_p6 = scmp.ge.s32.totalorder %s1891_s18, 6 }
   0xa   : > { %s2254_s20 = smov (%p27_p4, %s2252_s20), 0 }
   0xb   : > { %s81_s22 = ssub.s32 %s1887_s17, %s2254_s20  ;;  %145 = sbr.rel (%p1562_p6) target bundleno = 74 (0x4a), region = 16 }
   0xc   : > { %s83_s23 = sor.u32 %s82_s21, %s81_s22 }
   0xd   : > { %p84_p5 = scmp.eq.s32.totalorder %s83_s23, 0 }
   0xf   : > { %s2002_s25 = scalar_select %p84_p5, %s1871_s13, %s86_s24  }
  0x12   : > { %171 = sbr.rel (!%p95_p3) target bundleno = 74 (0x4a), region = 28  ;;  %s173_s26 = sand.u32 (%p95_p3), 1, %s1871_s13  }
  0x13   : > { %s1564_s27 = sshll.u32 (%p95_p3), %s1887_s17, 3  ;;  %s1563_s28 = sshll.u32 (%p95_p3), %s173_s26, 6 }
  0x14   : > { %s177_s29 = ssub.s32 (%p95_p3), 20, %s1564_s27  ;;  %s1590_s30 = sshll.u32 (%p95_p3), %s1887_s17, 4 }
  0x15   : > { %p178_p7 = scmp.lt.s32.totalorder (%p95_p3), %s177_s29, 8  ;;  %s183_s4 = sadd.s32 (%p95_p3), %s1883_s16, %s1590_s30 }
  0x16   : > { %s1568_s6 = sshll.u32 (%p95_p3), %s183_s4, 3  ;;  %s2017_s10 = scalar_lea.vmem (%p95_p3), [#allocation6], %s1563_s28  }
  0x17   : > { %s2015_s9 = scalar_lea.vmem (%p95_p3), %s2238_s2, %s1568_s6  }
  0x19   : > { %s2256_s29 = smov (!%p178_p7, %s177_s29), 8 }
  0x1a   : > { %s1565_s5 = sshll.u32 %s2256_s29, 7 }
  0x1b   : > { %p1569_p8 = scmp.eq.s32.totalorder %s1565_s5, 0 }
  0x1c   : > { %s2020_s11 = sshrl.u32 (!%p1569_p8), %s2256_s29, 3 }
  0x1d   : > { %188 = sbr.rel (%p1569_p8) target bundleno = 74 (0x4a), region = 32  ;;  %p1570_p9 = scmp.le.s32.totalorder (!%p1569_p8), %s2020_s11, 0 }
  0x24   : > { %1493 = sbr.rel (%p1570_p9) target bundleno = 53 (0x35), region = 135  ;;  %s2240_s21 = smov (!%p1570_p9), %s2017_s10 }
  0x25   : > { %s2241_s22 = smov (!%p1570_p9), %s2015_s9  ;;  %s2029_s23 = smov (!%p1570_p9), 0  }
  0x26   : > { %s2031_s24 = smov (!%p1570_p9), 0  }
  0x2b LB: >> { %v264_v0 = vld [vmem:[%s1899_s22] sm:$0xff]  ;;  %v266_v1 = vld [vmem:[%s1899_s22 + $0x10] sm:$0xff]  ;;  %s280_s26 = sadd.s32 1, %s1903_s23  ;;  %s258_s24 = sadd.s32 1, %s1907_s24   ;;  %s1907_s24 = sphi %s2031_s24, %s258_s24   ;;  %s1903_s23 = sphi %s2029_s23, %s2242_s23   ;;  %s1899_s22 = sphi %s2241_s22, %s285_s22   ;;  %s1895_s21 = sphi %s2240_s21, %s286_s21  }
  0x2c   : >> { %v268_v2 = vld [vmem:[%s1899_s22 + $0x20] sm:$0xff]  ;;  %265 = vst [vmem:[%s1895_s21] sm:$0xff] %v264_v0  ;;  %267 = vst [vmem:[%s1895_s21 + $0x8] sm:$0xff] %v266_v1  ;;  %v270_v3 = vld [vmem:[%s1899_s22 + $0x30] sm:$0xff]  ;;  %p281_p10 = scmp.ge.s32.totalorder %s280_s26, %s2020_s11  ;;  %p257_p11 = scmp.ge.s32.totalorder %s258_s24, %s2020_s11 }
  0x2d   : >> { %269 = vst [vmem:[%s1895_s21 + $0x10] sm:$0xff] %v268_v2  ;;  %v272_v4 = vld [vmem:[%s1899_s22 + $0x40] sm:$0xff]  ;;  %v274_v5 = vld [vmem:[%s1899_s22 + $0x50] sm:$0xff]  ;;  %271 = vst [vmem:[%s1895_s21 + $0x18] sm:$0xff] %v270_v3 }
  0x2e   : >> { %273 = vst [vmem:[%s1895_s21 + $0x20] sm:$0xff] %v272_v4  ;;  %275 = vst [vmem:[%s1895_s21 + $0x28] sm:$0xff] %v274_v5  ;;  %v276_v6 = vld [vmem:[%s1899_s22 + $0x60] sm:$0xff]  ;;  %v278_v7 = vld [vmem:[%s1899_s22 + $0x70] sm:$0xff]  ;;  %s2258_s26 = smov (%p281_p10, %s280_s26), 0  ;;  %260 = sbr.rel (!%p257_p11) target bundleno = 43 (0x2b), region = 141 }
  0x2f   : >> { %277 = vst [vmem:[%s1895_s21 + $0x30] sm:$0xff] %v276_v6  ;;  %279 = vst [vmem:[%s1895_s21 + $0x38] sm:$0xff] %v278_v7  ;;  %s1571_s27 = sshll.u32 %s2258_s26, 7  ;;  %s1572_s28 = sshll.u32 %s2258_s26, 6 }
  0x30   : >> { %s285_s22 = scalar_lea.vmem %s2015_s9, %s1571_s27   ;;  %s286_s21 = scalar_lea.vmem %s2017_s10, %s1572_s28 [#allocation6]  }
  0x31   : >> { %s2242_s23 = smov %s2258_s26 }
  0x35 PF: > { %s2053_s30 = sand.u32 7, %s2256_s29   ;;  %s1591_s4 = sshll.u32 %s2020_s11, 7 }
  0x36   : > { %s2057_s5 = scalar_lea.vmem %s2015_s9, %s1591_s4   ;;  %s1592_s6 = sshll.u32 %s2020_s11, 6 }
  0x37   : > { %s293_s7 = scalar_lea.vmem %s2017_s10, %s1592_s6 [#allocation6]   ;;  %p1576_p12 = scmp.le.s32.totalorder %s2053_s30, 0 }
  0x38   : > { %s1909_s8 = smov (!%p1576_p12), %s293_s7   ;;  %s1913_s24 = smov (!%p1576_p12), %s2057_s5  }
  0x39   : > { %1507 = sbr.rel (%p1576_p12) target bundleno = 74 (0x4a), region = 146  ;;  %s1917_s26 = smov (!%p1576_p12), 0  }
  0x3a   : > { %s1921_s21 = smov (!%p1576_p12), 0  }
  0x40 LB: >> { %v303_v8 = vld [vmem:[%s1915_s24] sm:$0xff]  ;;  %s305_s29 = sadd.s32 1, %s1919_s26  ;;  %s297_s21 = sadd.s32 1, %s1923_s21   ;;  %s1923_s21 = sphi %s1921_s21, %s297_s21   ;;  %s1919_s26 = sphi %s1917_s26, %s1918_s26   ;;  %s1915_s24 = sphi %s1913_s24, %s310_s24   ;;  %s1911_s8 = sphi %s1909_s8, %s311_s8  }
  0x41   : >> { %304 = vst [vmem:[%s1911_s8] sm:$0xff] %v303_v8  ;;  %p306_p13 = scmp.ge.s32.totalorder %s305_s29, %s2053_s30  ;;  %p296_p0 = scmp.ge.s32.totalorder %s297_s21, %s2053_s30 }
  0x43   : >> { %s2260_s29 = smov (%p306_p13, %s305_s29), 0  ;;  %299 = sbr.rel (!%p296_p0) target bundleno = 64 (0x40), region = 152 }
  0x44   : >> { %s1577_s9 = sshll.u32 %s2260_s29, 4  ;;  %s1578_s10 = sshll.u32 %s2260_s29, 3 }
  0x45   : >> { %s310_s24 = scalar_lea.vmem %s2057_s5, %s1577_s9   ;;  %s311_s8 = scalar_lea.vmem %s293_s7, %s1578_s10 [#allocation6]  }
  0x46   : >> { %s1918_s26 = smov %s2260_s29  }
  0x4a PF: > { %p1579_p1 = scmp.ge.s32.totalorder %s1891_s18, 1  ;;  %p316_p2 = scmp.lt.s32.totalorder %s1891_s18, 7 }
  0x4c   : > { %p317_p3 = pnand %p1579_p1, %p316_p2 }
  0x4d   : > { %s323_s11 = sand.u32 (!%p317_p3), 1, %s1867_s12   ;;  %s2070_s22 = sshll.u32 (!%p317_p3), %s1879_s15, 3 }
  0x4e   : > { %320 = sbr.rel (%p317_p3) target bundleno = 1205 (0x4b5), region = 80  ;;  %s1580_s23 = sshll.u32 (!%p317_p3), %s323_s11, 6 }
  0x4f   : > { %p362_p4 = scmp.lt.s32.totalorder (!%p317_p3), %s2070_s22, 19  ;;  %p370_p5 = scmp.lt.s32.totalorder (!%p317_p3), %s1879_s15, 2 }
  0x50   : > { %s325_s28 = scalar_lea.vmem (!%p317_p3), [#allocation6], %s1580_s23  ;;  %p1584_p6 = scmp.ne.s32.totalorder (!%p317_p3), %s1875_s14, 0 }
  0x51   : > { %v2075_v9 = vld [vmem:[%s325_s28] sm:$0xff] (!%p317_p3)  ;;  %v2077_v10 = vld [vmem:[%s325_s28 + $0x8] sm:$0xff] (!%p317_p3)  ;;  %v2079_v11 = vld [vmem:[%s325_s28 + $0x10] sm:$0xff] (!%p317_p3) }
  0x52   : > { %v2082_v12 = vld [vmem:[%s325_s28 + $0x18] sm:$0xff] (!%p317_p3)  ;;  %v2084_v13 = vld [vmem:[%s325_s28 + $0x20] sm:$0xff] (!%p317_p3)  ;;  %v2086_v14 = vld [vmem:[%s325_s28 + $0x28] sm:$0xff] (!%p317_p3) }
  0x53   : > { %v2091_v15 = vld [vmem:[%s325_s28 + $0x30] sm:$0xff] (!%p317_p3)  ;;  %v2093_v16 = vld [vmem:[%s325_s28 + $0x38] sm:$0xff] (!%p317_p3) }
  0x55   : > { %s363_s27 = scalar_select %p362_p4, %s2070_s22, 19 }
  0x56   : > { %s2262_s15 = smov (!%p370_p5, %s1879_s15), 2  ;;  %402 = sbr.rel (%p1584_p6) target bundleno = 269 (0x10d), region = 88 }
  0x57   : > { %s364_s4 = scalar_lea.vmem %s2236_s0, %s363_s27  ;;  %s1582_s5 = sshll.u32 %s2262_s15, 3  ;;  %v427_v33 = vlaneseq (!%p1584_p6)  ;;  %v1925_v34 = vmov (!%p1584_p6), 1966171168   ;;  %vm608_vm0 = vcmask (!%p1584_p6), 7168  }
  0x58   : > { %v2095_v17 = vld [vmem:[%s364_s4] sm:$0x1]  ;;  %v2097_v18 = vld [vmem:[%s364_s4 + $0x1] sm:$0x1]  ;;  %s373_s8 = scalar_lea.vmem %s2237_s1, %s1582_s5  ;;  %s2105_s21 = scalar_lea.vmem %s2239_s3, %s1582_s5  ;;  %v2107_v19 = vld [vmem:[%s364_s4 + $0x2] sm:$0x1]  ;;  %v425_v35 = vunpack.c.l.s4 (!%p1584_p6), %v1925_v34 }
  0x59   : > { %v2109_v20 = vld [vmem:[%s364_s4 + $0x3] sm:$0x1]  ;;  %v2111_v21 = vld [vmem:[%s364_s4 + $0x4] sm:$0x1]  ;;  %v2113_v22 = vld [vmem:[%s364_s4 + $0x5] sm:$0x1]  ;;  %v404_v25 = vmul.f32 (!%p1584_p6), %v2095_v17, %v2095_v17  ;;  %v405_v26 = vmul.f32 (!%p1584_p6), %v2097_v18, %v2097_v18  ;;  %v406_v27 = vmul.f32 (!%p1584_p6), %v2107_v19, %v2107_v19 }
  0x5a   : > { %v2115_v23 = vld [vmem:[%s364_s4 + $0x6] sm:$0x1]  ;;  %v2117_v24 = vld [vmem:[%s364_s4 + $0x7] sm:$0x1]  ;;  %v407_v28 = vmul.f32 (!%p1584_p6), %v2109_v20, %v2109_v20  ;;  %v408_v29 = vmul.f32 (!%p1584_p6), %v2111_v21, %v2111_v21  ;;  %v409_v30 = vmul.f32 (!%p1584_p6), %v2113_v22, %v2113_v22  ;;  %v428_v38 = vshrl.u32 (!%p1584_p6), %v427_v33, 7 }
  0x5b   : > { %v410_v31 = vmul.f32 (!%p1584_p6), %v2115_v23, %v2115_v23  ;;  %v411_v32 = vmul.f32 (!%p1584_p6), %v2117_v24, %v2117_v24  ;;  %v403_v36 = vld [vmem:[%s373_s8] sm:$0xff] (!%p1584_p6)  ;;  %v420_v37 = vcombine.low (!%p1584_p6), %v404_v25, %v405_v26  ;;  %v426_v42 = vunpack.c.0.s8 (!%p1584_p6), %v425_v35 }
  0x5c   : > { %v421_v39 = vcombine.low (!%p1584_p6), %v406_v27, %v407_v28  ;;  %v422_v40 = vcombine.low (!%p1584_p6), %v408_v29, %v409_v30  ;;  %v480_v43 = vcombine.high (!%p1584_p6), %v403_v36, %v403_v36  ;;  %v472_v6 = vmul.f32 (!%p1584_p6), %v403_v36, %v403_v36 }
  0x5d   : > { %v423_v41 = vcombine.low %v410_v31, %v411_v32  ;;  %v429_v44 = vsub.s32 %v426_v42, %v428_v38 }
  0x5f   : > { %v430_v45 = vrot.slane %v420_v37, %v429_v44  ;;  %v437_v46 = vrot.slane %v421_v39, %v429_v44  ;;  %v444_v47 = vrot.slane %v422_v40, %v429_v44  ;;  %v451_v48 = vrot.slane %v423_v41, %v429_v44 }
  0x60   : > { %v487_v49 = vrot.slane %v403_v36, %v429_v44  ;;  %v494_v50 = vrot.slane %v480_v43, %v429_v44  ;;  %v1926_v40 = vmov 1.0  }
  0x61   : > { %v452_v51 = vcombine.low %v430_v45, %v437_v46  ;;  %v453_v52 = vcombine.low %v444_v47, %v451_v48  ;;  %612 = vst.msk [vmem:[#allocation5] sm:$0xff] %vm608_vm0, %v1926_v40 }
  0x62   : > { %v495_v53 = vcombine.high %v487_v49, %v487_v49  ;;  %v496_v54 = vcombine.high %v494_v50, %v494_v50  ;;  %v503_v55 = vrot.slane %v487_v49, %v429_v44  ;;  %v510_v56 = vrot.slane %v494_v50, %v429_v44 }
  0x63   : > { %v460_v57 = vrot.slane %v452_v51, %v429_v44  ;;  %v467_v58 = vrot.slane %v453_v52, %v429_v44 }
  0x64   : > { %v517_v59 = vrot.slane %v495_v53, %v429_v44  ;;  %v525_v60 = vcombine.high %v503_v55, %v503_v55  ;;  %v524_v61 = vrot.slane %v496_v54, %v429_v44  ;;  %v526_v62 = vcombine.high %v510_v56, %v510_v56 }
  0x65   : > { %v468_v63 = vcombine.low %v460_v57, %v467_v58  ;;  %v537_v0 = vmul.f32 %v503_v55, %v2095_v17  ;;  %v541_v1 = vmul.f32 %v510_v56, %v2111_v21 }
  0x66   : > { %v527_v2 = vcombine.high %v517_v59, %v517_v59  ;;  %v528_v3 = vcombine.high %v524_v61, %v524_v61  ;;  %v538_v4 = vmul.f32 %v517_v59, %v2097_v18  ;;  %v539_v5 = vmul.f32 %v525_v60, %v2107_v19 }
  0x67   : > { %470 = vadd.xlane.f32.xlu0 %v468_v63  ;;  %v542_v7 = vmul.f32 %v524_v61, %v2113_v22  ;;  %v543_v8 = vmul.f32 %v526_v62, %v2115_v23 }
  0x68   : > { %v540_v25 = vmul.f32 %v527_v2, %v2109_v20  ;;  %v544_v26 = vmul.f32 %v528_v3, %v2117_v24  ;;  %v553_v27 = vcombine.low %v537_v0, %v538_v4 }
  0x69   : > { %v555_v28 = vcombine.low %v541_v1, %v542_v7 }
  0x6a   : > { %v554_v29 = vcombine.low %v539_v5, %v540_v25  ;;  %v556_v30 = vcombine.low %v543_v8, %v544_v26  ;;  %v563_v31 = vrot.slane %v553_v27, %v429_v44 }
  0x6b   : > { %473 = vadd.xlane.f32.xlu0 %v472_v6  ;;  %v577_v32 = vrot.slane %v555_v28, %v429_v44 }
  0x6c   : > { %v570_v33 = vrot.slane %v554_v29, %v429_v44  ;;  %v584_v34 = vrot.slane %v556_v30, %v429_v44 }
  0x6e   : > { %v585_v35 = vcombine.low %v563_v31, %v570_v33  ;;  %v586_v37 = vcombine.low %v577_v32, %v584_v34 }
  0x70   : > { %v593_v36 = vrot.slane %v585_v35, %v429_v44  ;;  %v600_v38 = vrot.slane %v586_v37, %v429_v44 }
  0x72   : > { %v601_v39 = vcombine.low %v593_v36, %v600_v38 }
  0x74   : > { %603 = vadd.xlane.f32.xlu1 %v601_v39 }
  0xf4   : > { %v471_v41 = vpop.xlane.xlu0 %470 }
  0xf5   : > { %v475_v42 = vmax.f32 %v471_v41, 1e-24 }
  0xf7   : > { %1776 = vrsqrt.f32 %v475_v42 }
  0xf8   : > { %v474_v43 = vpop.xlane.xlu0 %473 }
  0xf9   : > { %v477_v45 = vmax.f32 %v474_v43, 1e-24 }
  0xfb   : > { %1778 = vrsqrt.f32 %v477_v45 }
 0x101   : > { %v1777_v46 = vpop.eup %1776  ;;  %v604_v48 = vpop.xlane.xlu1 %603 }
 0x102   : > { %609 = vst.msk [vmem:[#allocation2] sm:$0xff] %vm608_vm0, %v1777_v46 }
 0x105   : > { %v1779_v47 = vpop.eup %1778 }
 0x106   : > { %v605_v49 = vmul.f32 %v1779_v47, %v1777_v46 }
 0x108   : > { %v606_v50 = vmul.f32 %v605_v49, %v604_v48 }
 0x10a   : > { %v607_v44 = vmul.f32 20.0, %v606_v50 }
 0x10c   : > { %610 = vst.msk [vmem:[#allocation3] sm:$0xff] %vm608_vm0, %v607_v44  ;;  %611 = vst.msk [vmem:[#allocation4] sm:$0xff] %vm608_vm0, %v607_v44 }
 0x10d PF: > { %v1173_v51 = vmul.f32 %v2075_v9, %v2075_v9  ;;  %v1175_v52 = vmul.f32 %v2079_v11, %v2079_v11  ;;  %v1174_v53 = vmul.f32 %v2077_v10, %v2077_v10  ;;  %v1176_v54 = vmul.f32 %v2082_v12, %v2082_v12  ;;  %v1213_v5 = vld [vmem:[#allocation2] sm:$0xff]  ;;  %s1585_s15 = sshll.u32 %s1875_s14, 3  ;;  %p1586_p7 = scmp.ne.s32.totalorder %s1875_s14, 1 }
 0x10e   : > { %v1927_v55 = vmov 0.0   ;;  %vm1928_vm1 = vmmov 0   ;;  %v1177_v56 = vmul.f32 %v2084_v13, %v2084_v13  ;;  %v1178_v57 = vmul.f32 %v2086_v14, %v2086_v14 }
 0x10f   : > { %1181 = vadd.xlane.f32.xlu0 %v1173_v51  ;;  %1185 = vadd.xlane.f32.xlu1 %v1175_v52  ;;  %v1251_v40 = vlaneseq  ;;  %vm1285_vm2 = vcmask 1041409   ;;  %vm1287_vm3 = vcmask 1042434   ;;  %vm1289_vm4 = vcmask 1043459  }
 0x110   : > { %1609 = vmatprep.subr.mxu0 %v1927_v55  ;;  %1614 = vmatprep.subr.mxu1 %v1927_v55  ;;  %vm1291_vm5 = vcmask 1044484   ;;  %vm1293_vm6 = vcmask 1045509   ;;  %vm1295_vm7 = vcmask 1046534   ;;  %vm1297_vm8 = vcmask 1047559  }
 0x111   : > { %1610 = vmatpush3.xpose.msra.mxu0 %v2075_v9  ;;  %1615 = vmatpush3.xpose.msra.mxu1 %v2077_v10  ;;  %v1179_v9 = vmul.f32 %v2091_v15, %v2091_v15  ;;  %v1180_v10 = vmul.f32 %v2093_v16, %v2093_v16  ;;  %v1252_v42 = vand.u32 127, %v1251_v40  ;;  %v2188_v43 = vshrl.u32 %v1251_v40, 7 }
 0x112   : > { %1611 = vmatprep.mubr.msk.f32.mxu0 %vm1928_vm1, %v1927_v55  ;;  %1616 = vmatprep.mubr.msk.f32.mxu1 %vm1928_vm1, %v1927_v55  ;;  %vm1362_vm10 = vcmask 64512   ;;  %vm1384_vm11 = vcmask 7168  }
 0x113   : > { %1183 = vadd.xlane.f32.xlu0 %v1174_v53  ;;  %1187 = vadd.xlane.f32.xlu1 %v1176_v54  ;;  %v1255_v46 = vsub.s32 %v1252_v42, %v2188_v43 }
 0x114   : > { %1612 = vmatmul.mubr.f32.vlgmr.msra.gmra.mrb[0].mxu0 %v2095_v17  ;;  %1617 = vmatmul.mubr.f32.vlgmr.msra.gmra.mrb[0].mxu1 %v2097_v18 }
 0x115   : > { %1619 = vmatprep.subr.mxu0 %v1927_v55  ;;  %1624 = vmatprep.subr.mxu1 %v1927_v55 }
 0x116   : > { %1620 = vmatpush3.xpose.msra.mxu0 %v2079_v11  ;;  %1625 = vmatpush3.xpose.msra.mxu1 %v2082_v12  ;;  %v1929_v11 = vmov 0  }
 0x117   : > { %1189 = vadd.xlane.f32.xlu0 %v1177_v56  ;;  %1191 = vadd.xlane.f32.xlu1 %v1178_v57 }
 0x118   : > { %1621 = vmatprep.mubr.msk.f32.mxu0 %vm1928_vm1, %v1927_v55  ;;  %1626 = vmatprep.mubr.msk.f32.mxu1 %vm1928_vm1, %v1927_v55 }
 0x119   : > { %1622 = vmatmul.mubr.f32.vlgmr.msra.gmra.mrb[2].mxu0 %v2107_v19  ;;  %1627 = vmatmul.mubr.f32.vlgmr.msra.gmra.mrb[2].mxu1 %v2109_v20 }
 0x11a   : > { %1629 = vmatprep.subr.mxu0 %v1927_v55  ;;  %1634 = vmatprep.subr.mxu1 %v1927_v55 }
 0x11b   : > { %1193 = vadd.xlane.f32.xlu0 %v1179_v9  ;;  %1195 = vadd.xlane.f32.xlu1 %v1180_v10 }
 0x11c   : > { %1630 = vmatpush3.xpose.msra.mxu0 %v2084_v13  ;;  %1635 = vmatpush3.xpose.msra.mxu1 %v2086_v14 }
 0x11d   : > { %1631 = vmatprep.mubr.msk.f32.mxu0 %vm1928_vm1, %v1927_v55  ;;  %1636 = vmatprep.mubr.msk.f32.mxu1 %vm1928_vm1, %v1927_v55 }
 0x11e   : > { %1639 = vmatprep.subr.mxu0 %v1927_v55  ;;  %1644 = vmatprep.subr.mxu1 %v1927_v55 }
 0x11f   : > { %1632 = vmatmul.mubr.f32.vlgmr.msra.gmra.mrb[4].mxu0 %v2111_v21  ;;  %1637 = vmatmul.mubr.f32.vlgmr.msra.gmra.mrb[4].mxu1 %v2113_v22 }
 0x120   : > { %1640 = vmatpush3.xpose.msra.mxu0 %v2091_v15  ;;  %1645 = vmatpush3.xpose.msra.mxu1 %v2093_v16 }
 0x121   : > { %1641 = vmatprep.mubr.msk.f32.mxu0 %vm1928_vm1, %v1927_v55  ;;  %1646 = vmatprep.mubr.msk.f32.mxu1 %vm1928_vm1, %v1927_v55 }
 0x122   : > { %1780 = vset.pattern.permute.xlu0 %v1929_v11  ;;  %1781 = vset.pattern.permute.xlu1 %v1929_v11 }
 0x123   : > { %1642 = vmatmul.mubr.f32.vlgmr.msra.gmra.mrb[6].mxu0 %v2115_v23  ;;  %1647 = vmatmul.mubr.f32.vlgmr.msra.gmra.mrb[6].mxu1 %v2117_v24 }
 0x19c   : > { %v1182_v12 = vpop.xlane.xlu0 %1181  ;;  %v1186_v13 = vpop.xlane.xlu1 %1185 }
 0x19d   : > { %v1197_v14 = vmax.f32 %v1182_v12, 1e-24  ;;  %v1199_v15 = vmax.f32 %v1186_v13, 1e-24 }
 0x19f   : > { %1782 = vrsqrt.f32 %v1197_v14 }
 0x1a0   : > { %v1184_v17 = vpop.xlane.xlu0 %1183  ;;  %v1188_v19 = vpop.xlane.xlu1 %1187 }
 0x1a1   : > { %v1198_v18 = vmax.f32 %v1184_v17, 1e-24  ;;  %v1200_v16 = vmax.f32 %v1188_v19, 1e-24 }
 0x1a3   : > { %1784 = vrsqrt.f32 %v1198_v18 }
 0x1a4   : > { %1786 = vrsqrt.f32 %v1199_v15  ;;  %v1190_v20 = vpop.xlane.xlu0 %1189  ;;  %v1192_v23 = vpop.xlane.xlu1 %1191 }
 0x1a5   : > { %1788 = vrsqrt.f32 %v1200_v16  ;;  %v1201_v22 = vmax.f32 %v1190_v20, 1e-24  ;;  %v1202_v58 = vmax.f32 %v1192_v23, 1e-24 }
 0x1a7   : > { %1790 = vrsqrt.f32 %v1201_v22 }
 0x1a8   : > { %v1194_v59 = vpop.xlane.xlu0 %1193  ;;  %1792 = vrsqrt.f32 %v1202_v58  ;;  %v1196_v62 = vpop.xlane.xlu1 %1195 }
 0x1a9   : > { %v1783_v21 = vpop.eup %1782  ;;  %v1203_v61 = vmax.f32 %v1194_v59, 1e-24  ;;  %v1204_v0 = vmax.f32 %v1196_v62, 1e-24 }
 0x1aa   : > { %1228 = vperm.xlu0 %1780, %v1783_v21  }
 0x1ab   : > { %1794 = vrsqrt.f32 %v1203_v61 }
 0x1ac   : > { %1796 = vrsqrt.f32 %v1204_v0 }
 0x1ad   : > { %v1785_v24 = vpop.eup %1784 }
 0x1ae   : > { %1231 = vperm.xlu1 %1781, %v1785_v24   ;;  %v1787_v60 = vpop.eup %1786 }
 0x1af   : > { %v1789_v63 = vpop.eup %1788 }
 0x1b1   : > { %v1791_v1 = vpop.eup %1790 }
 0x1b2   : > { %1234 = vperm.xlu1 %1781, %v1787_v60   ;;  %v1793_v2 = vpop.eup %1792 }
 0x1b5   : > { %v1795_v3 = vpop.eup %1794 }
 0x1b6   : > { %1237 = vperm.xlu1 %1781, %v1789_v63   ;;  %v1797_v4 = vpop.eup %1796 }
 0x1ba   : > { %1240 = vperm.xlu1 %1781, %v1791_v1  }
 0x1be   : > { %1243 = vperm.xlu1 %1781, %v1793_v2  }
 0x1c2   : > { %1246 = vperm.xlu1 %1781, %v1795_v3  }
 0x1c6   : > { %1249 = vperm.xlu1 %1781, %v1797_v4  }
 0x1ca   : > { %1216 = vperm.xlu1 %1781, %v1213_v5  }
 0x1e7   : > { %v679_v6 = vpop.f32.mrb[0].mxu0  ;;  %v749_v7 = vpop.f32.mrb[0].mxu1 }
 0x1e8   : > { %v1613_v8 = vpop.f32.mrb[1].mxu0  ;;  %v1618_v25 = vpop.f32.mrb[1].mxu1 }
 0x1e9   : > { %v1334_v8 = vstv %s1585_s15 }
 0x1ec   : > { %v819_v26 = vpop.f32.mrb[2].mxu0  ;;  %v889_v27 = vpop.f32.mrb[2].mxu1 }
 0x1ed   : > { %v1623_v28 = vpop.f32.mrb[3].mxu0  ;;  %v1628_v29 = vpop.f32.mrb[3].mxu1 }
 0x1f2   : > { %v959_v30 = vpop.f32.mrb[4].mxu0  ;;  %v1029_v31 = vpop.f32.mrb[4].mxu1 }
 0x1f3   : > { %v1633_v32 = vpop.f32.mrb[5].mxu0  ;;  %v1638_v33 = vpop.f32.mrb[5].mxu1 }
 0x1f6   : > { %v1099_v34 = vpop.f32.mrb[6].mxu0  ;;  %v1169_v35 = vpop.f32.mrb[6].mxu1 }
 0x1f7   : > { %v1643_v37 = vpop.f32.mrb[7].mxu0  ;;  %v1648_v36 = vpop.f32.mrb[7].mxu1 }
 0x229   : > { %v1229_v47 = vpop.permute.xlu0 %1228 }
 0x22a   : > { %v1256_v44 = vrot.slane %v1229_v47, %v1255_v46 }
 0x22d   : > { %v1232_v38 = vpop.permute.xlu1 %1231 }
 0x22e   : > { %v1260_v49 = vrot.slane %v1232_v38, %v1255_v46 }
 0x230   : > { %v1286_v54 = vsel %vm1285_vm2, %v1260_v49, %v1256_v44 }
 0x231   : > { %v1235_v39 = vpop.permute.xlu1 %1234 }
 0x232   : > { %v1264_v50 = vrot.slane %v1235_v39, %v1255_v46 }
 0x234   : > { %v1288_v56 = vsel %vm1287_vm3, %v1264_v50, %v1286_v54 }
 0x235   : > { %v1238_v41 = vpop.permute.xlu1 %1237 }
 0x236   : > { %v1268_v51 = vrot.slane %v1238_v41, %v1255_v46 }
 0x238   : > { %v1290_v9 = vsel %vm1289_vm4, %v1268_v51, %v1288_v56  ;;  %v1367_v56 = vld [vmem:[#allocation5] sm:$0xff] }
 0x239   : > { %v1241_v45 = vpop.permute.xlu1 %1240 }
 0x23a   : > { %v1272_v52 = vrot.slane %v1241_v45, %v1255_v46 }
 0x23c   : > { %v1292_v10 = vsel %vm1291_vm5, %v1272_v52, %v1290_v9 }
 0x23d   : > { %v1244_v48 = vpop.permute.xlu1 %1243 }
 0x23e   : > { %v1276_v55 = vrot.slane %v1244_v48, %v1255_v46 }
 0x240   : > { %v1294_v12 = vsel %vm1293_vm6, %v1276_v55, %v1292_v10 }
 0x241   : > { %v1247_v53 = vpop.permute.xlu1 %1246 }
 0x242   : > { %v1280_v57 = vrot.slane %v1247_v53, %v1255_v46 }
 0x244   : > { %v1296_v14 = vsel %vm1295_vm7, %v1280_v57, %v1294_v12  ;;  %v1930_v12 = vmov (!%p1586_p7), 0  }
 0x245   : > { %v1250_v11 = vpop.permute.xlu1 %1249  ;;  %1802 = vset.pattern.permute.xlu0 (!%p1586_p7), %v1930_v12 }
 0x246   : > { %v1284_v13 = vrot.slane %v1250_v11, %v1255_v46  ;;  %v1361_v46 = vld [vmem:[#allocation4] sm:$0xff] }
 0x248   : > { %v1298_v17 = vsel %vm1297_vm8, %v1284_v13, %v1296_v14  ;;  %v1401_v13 = vstv (!%p1586_p7), %s2070_s22 }
 0x249   : > { %v1217_v18 = vpop.permute.xlu1 %1216 }
 0x24a   : > { %v1300_v15 = vmul.f32 %v1298_v17, %v1217_v18  ;;  %v1402_v18 = vadd.s32 (!%p1586_p7), %v1401_v13, %v2188_v43 }
 0x24c   : > { %v1302_v19 = vrot.slane %v1300_v15, 1  ;;  %v1303_v16 = vrot.slane %v1300_v15, 2  ;;  %v1304_v20 = vrot.slane %v1300_v15, 3  ;;  %v1305_v21 = vrot.slane %v1300_v15, 4 }
 0x24d   : > { %v1306_v22 = vrot.slane %v1300_v15, 5  ;;  %v1307_v23 = vrot.slane %v1300_v15, 6  ;;  %v1308_v24 = vrot.slane %v1300_v15, 7  ;;  %v1317_v58 = vmul.f32 %v1300_v15, %v679_v6 }
 0x24e   : > { %v1318_v59 = vmul.f32 %v1302_v19, %v749_v7  ;;  %v1319_v60 = vmul.f32 %v1303_v16, %v819_v26  ;;  %v1320_v61 = vmul.f32 %v1304_v20, %v889_v27  ;;  %v1321_v62 = vmul.f32 %v1305_v21, %v959_v30  ;;  %v1396_v19 = vld [vmem:[#allocation3] sm:$0xff] (!%p1586_p7) }
 0x24f   : > { %v1322_v63 = vmul.f32 %v1306_v22, %v1029_v31  ;;  %v1323_v0 = vmul.f32 %v1307_v23, %v1099_v34  ;;  %v1324_v4 = vmul.f32 %v1308_v24, %v1169_v35  ;;  %v1325_v25 = vmul.f32 20.0, %v1317_v58 }
 0x250   : > { %v1326_v1 = vmul.f32 20.0, %v1318_v59  ;;  %v1327_v2 = vmul.f32 20.0, %v1319_v60  ;;  %v1328_v3 = vmul.f32 20.0, %v1320_v61  ;;  %v1329_v5 = vmul.f32 20.0, %v1321_v62 }
 0x251   : > { %v1330_v32 = vmul.f32 20.0, %v1322_v63  ;;  %v1331_v33 = vmul.f32 20.0, %v1323_v0  ;;  %v1332_v26 = vmul.f32 20.0, %v1324_v4  ;;  %v1335_v27 = vadd.s32 %v1334_v8, %v1252_v42 }
 0x252   : > { %v1345_v28 = vrot.slane %v1326_v1, 7  ;;  %v1347_v29 = vrot.slane %v1327_v2, 6  ;;  %v1349_v7 = vrot.slane %v1328_v3, 5  ;;  %v1351_v31 = vrot.slane %v1329_v5, 4 }
 0x253   : > { %v1353_v37 = vrot.slane %v1330_v32, 3  ;;  %v1355_v36 = vrot.slane %v1331_v33, 2  ;;  %v1357_v39 = vrot.slane %v1332_v26, 1  ;;  %vm1336_vm9 = vcmp.lt.s32.totalorder %v1335_v27, 12 }
 0x254   : > { %v1346_v6 = vsel %vm1285_vm2, %v1345_v28, %v1325_v25  ;;  %vm1403_vm12 = vcmp.lt.s32.totalorder (!%p1586_p7), %v1402_v18, 20 }
 0x255   : > { %v1348_v30 = vsel %vm1287_vm3, %v1347_v29, %v1346_v6 }
 0x256   : > { %v1350_v34 = vsel %vm1289_vm4, %v1349_v7, %v1348_v30 }
 0x257   : > { %v1352_v35 = vsel %vm1291_vm5, %v1351_v31, %v1350_v34 }
 0x258   : > { %v1354_v38 = vsel %vm1293_vm6, %v1353_v37, %v1352_v35 }
 0x259   : > { %v1356_v40 = vsel %vm1295_vm7, %v1355_v36, %v1354_v38 }
 0x25a   : > { %v1358_v41 = vsel %vm1297_vm8, %v1357_v39, %v1356_v40 }
 0x25b   : > { %v1360_v45 = vsel %vm1336_vm9, %v1358_v41, -inf }
 0x25c   : > { %v1363_v42 = vsel %vm1362_vm10, %v1360_v45, -inf }
 0x25d   : > { %1364 = vmax.xlane.f32.xlu0 %v1363_v42 }
 0x2ea   : > { %v1365_v47 = vpop.xlane.xlu0 %1364 }
 0x2eb   : > { %v1366_v48 = vmax.f32 %v1361_v46, %v1365_v47 }
 0x2ed   : > { %v1368_v49 = vsub.f32 %v1361_v46, %v1366_v48  ;;  %1386 = vst.msk [vmem:[#allocation4] sm:$0xff] %vm1384_vm11, %v1366_v48  ;;  %1374 = vperm.xlu1 %1781, %v1366_v48  }
 0x2ef   : > { %v1369_v54 = vmul.f32 1.442695, %v1368_v49 }
 0x2f4   : > { %v1391_v17 = vld [vmem:[#allocation4] sm:$0xff] (!%p1586_p7) }
 0x36c   : > { %v1375_v50 = vpop.permute.xlu1 %1374 }
 0x36d   : > { %v1377_v44 = vsub.f32 %v1360_v45, %v1375_v50 }
 0x36f   : > { %v1378_v51 = vmul.f32 1.442695, %v1377_v44 }
 0x371   : > { %1798 = vpow2.f32 %v1378_v51 }
 0x372   : > { %1800 = vpow2.f32 %v1369_v54 }
 0x37b   : > { %v1799_v52 = vpop.eup %1798 }
 0x37c   : > { %v1380_v53 = vsel %vm1362_vm10, %v1799_v52, 0.0  ;;  %v1801_v55 = vpop.eup %1800 }
 0x37d   : > { %1381 = vadd.xlane.f32.xlu1 %v1380_v53  ;;  %v1371_v57 = vmul.f32 %v1801_v55, %v1367_v56 }
 0x407   : > { %1390 = sbr.rel (%p1586_p7) target bundleno = 1205 (0x4b5), region = 92 }
 0x40a   : > { %v1382_v9 = vpop.xlane.xlu1 %1381 }
 0x40b   : > { %v1383_v10 = vadd.f32 %v1382_v9, %v1371_v57 }
 0x40d   : > { %1385 = vst.msk [vmem:[#allocation5] sm:$0xff] %vm1384_vm11, %v1383_v10 }
 0x414   : > { %v1392_v11 = vld [vmem:[#allocation5] sm:$0xff] }
 0x415   : > { %1803 = vlog2.f32 %v1392_v11 }
 0x41f   : > { %v1804_v14 = vpop.eup %1803 }
 0x420   : > { %v1394_v15 = vmul.f32 0.6931472, %v1804_v14 }
 0x422   : > { %v1395_v16 = vadd.f32 %v1394_v15, %v1391_v17 }
 0x424   : > { %v1397_v20 = vsub.f32 %v1395_v16, %v1396_v19 }
 0x426   : > { %v1404_v21 = vsel %vm1403_vm12, %v1397_v20, 0.0 }
 0x427   : > { %v1405_v22 = vsel %vm1384_vm11, %v1404_v21, 0.0 }
 0x428   : > { %v1406_v23 = vrot.slane %v1405_v22, 4 }
 0x42a   : > { %v1407_v24 = vadd.f32 %v1406_v23, %v1405_v22 }
 0x42c   : > { %v1408_v58 = vrot.slane %v1407_v24, 2 }
 0x42e   : > { %v1409_v59 = vadd.f32 %v1408_v58, %v1407_v24 }
 0x430   : > { %v1410_v60 = vrot.slane %v1409_v59, 1 }
 0x432   : > { %v1411_v61 = vadd.f32 %v1410_v60, %v1409_v59 }
 0x434   : > { %1414 = vperm.xlu0 %1802, %v1411_v61  }
 0x4b3   : > { %v1415_v62 = vpop.permute.xlu0 %1414 }
 0x4b4   : > { %1417 = vst [vmem:[%s2105_s21] sm:$0xff] %v1415_v62 }
 0x4b5 PF: > { %s13_s18 = sadd.s32 1, %s1891_s18   ;;  %s2243_s12 = smov %s1871_s13 }
 0x4b6   : > { %p10_p8 = scmp.ge.s32.totalorder %s13_s18, 8   ;;  %s2244_s13 = smov %s2002_s25 }
 0x4b7   : > { %s2245_s14 = smov %s1883_s16  ;;  %s2246_s15 = smov %s1887_s17 }
 0x4b8   : > { %s2247_s16 = smov %s2250_s19  ;;  %s2248_s17 = smov %s2254_s20 }
 0x4b9   :  { %12 = sbr.rel (!%p10_p8) target bundleno = 4 (0x4), region = 163 }

</bundles_post_ra>
